<compile_context>
chip_gen: v6e
topology: v6e:2x2x1
jax: 0.10.0
libtpu: 0.0.40
codegen_flags: <defaults>
</compile_context>

<pallas_src>
import math
import functools

import jax
import jax.numpy as jnp
from jax import lax
from jax.experimental import pallas as pl
from jax.experimental.pallas import tpu as pltpu


def _kernel_multi_k(x_ref, w_ref, b_ref, o_ref, acc_ref, *, scale, fused_lrelu):
    """K is tiled: accumulate partial products in an f32 VMEM scratch."""
    k = pl.program_id(2)
    p = jnp.dot(x_ref[...], w_ref[...], preferred_element_type=jnp.float32)

    @pl.when(k == 0)
    def _first():
        acc_ref[...] = p            # no zero-init + RMW

    @pl.when(k > 0)
    def _accum():
        acc_ref[...] += p

    @pl.when(k == pl.num_programs(2) - 1)
    def _epilogue():
        # scale already includes sqrt(2) when fused; bias_eff likewise.
        y = acc_ref[...] * scale + b_ref[...]
        if fused_lrelu:
            y = jnp.maximum(y, 0.2 * y)
        o_ref[...] = y.astype(o_ref.dtype)


def _kernel_single_k(x_ref, w_ref, b_ref, o_ref, *, scale, fused_lrelu):
    """K fits in one block: no scratch accumulator at all."""
    p = jnp.dot(x_ref[...], w_ref[...], preferred_element_type=jnp.float32)
    y = p * scale + b_ref[...]
    if fused_lrelu:
        y = jnp.maximum(y, 0.2 * y)
    o_ref[...] = y.astype(o_ref.dtype)


def _round_up(v, m):
    return ((v + m - 1) // m) * m


def _select_tiles(M, N, K, x_item, w_item, o_item,
                  block_m, block_n, block_k, vmem_budget):
    tm = M if M <= block_m else block_m
    tn = N if N <= block_n else block_n
    tk = K if K <= block_k else block_k

    # v7x megacore: guarantee >= 2 "parallel" blocks when the layer is big
    # enough to be worth splitting (otherwise one TensorCore idles).
    if pl.cdiv(M, tm) == 1 and pl.cdiv(N, tn) == 1 and N >= 256:
        tn = max(128, _round_up((N + 1) // 2, 128))

    def need(tm_, tn_, tk_):
        nk = pl.cdiv(K, tk_)
        b = 2 * (tm_ * tk_ * x_item + tk_ * tn_ * w_item + tm_ * tn_ * o_item)
        b += 2 * tn_ * 4                      # bias (1, tn) f32, double-buffered
        if nk > 1:
            b += tm_ * tn_ * 4                # f32 accumulator scratch
        return b

    # Shrink tiled (not full-extent) dims until the double-buffered working
    # set fits the budget (keeps v7x's 64 MiB VMEM safe with headroom).
    while need(tm, tn, tk) > vmem_budget:
        if tm < M and tm > 256:
            tm //= 2
        elif tk < K and tk > 256:
            tk //= 2
        elif tn < N and tn > 256:
            tn //= 2
        else:
            break
    return tm, tn, tk, need(tm, tn, tk)


def equal_linear(x, weight, bias, *, lr_mul=1.0, bias_init=0.0,
                 activation=None, operand_dtype=None,
                 block_m=1024, block_n=512, block_k=512):
    *lead, in_dim = x.shape
    out_dim, in_dim_w = weight.shape
    assert in_dim == in_dim_w

    fused = (activation == 'fused_lrelu')
    scale = 1.0 / math.sqrt(in_dim) * lr_mul

    x2 = x.reshape(-1, in_dim)
    M = x2.shape[0]
    out_dtype = x.dtype

    # Optional operand downcast for the weight-bandwidth-bound regime
    # (small M, big weight).  Accumulation stays f32 in the kernel.
    # TODO(synk): per-generation int8 (v5e/v6e) / fp8 (v7x) weight quant would
    # halve weight traffic again; left out to keep semantics exact.
    if operand_dtype is not None:
        x2 = x2.astype(operand_dtype)
        weight = weight.astype(operand_dtype)

    # Pre-transpose ONCE so the kernel uses the canonical (tm,tk)x(tk,tn)
    # contraction (no per-K-tile transpose on the MXU path).
    wT = weight.T                                        # (in_dim, out_dim)

    # Effective bias (and the sqrt(2) fused_lrelu gain) precomputed in f32.
    bias_eff = bias.astype(jnp.float32) * lr_mul + bias_init
    if fused:
        bias_eff = bias_eff * math.sqrt(2.0)
        scale = scale * math.sqrt(2.0)
    bias_eff = bias_eff.reshape(1, out_dim)

    x_item = jnp.dtype(x2.dtype).itemsize
    w_item = jnp.dtype(wT.dtype).itemsize
    o_item = jnp.dtype(out_dtype).itemsize

    vmem_budget = 40 << 20
    tm, tn, tk, needed = _select_tiles(M, out_dim, in_dim,
                                       x_item, w_item, o_item,
                                       block_m, block_n, block_k, vmem_budget)

    # Zero-pad the reduction axis so a partial tail K tile never accumulates
    # out-of-bounds garbage.  (M/N tails are safe: output stores are masked.)
    Kp = _round_up(in_dim, tk)
    if Kp != in_dim:
        x2 = jnp.pad(x2, ((0, 0), (0, Kp - in_dim)))
        wT = jnp.pad(wT, ((0, Kp - in_dim), (0, 0)))

    grid = (pl.cdiv(M, tm), pl.cdiv(out_dim, tn), Kp // tk)
    nk = grid[2]

    if nk == 1:
        kernel = functools.partial(_kernel_single_k, scale=scale,
                                   fused_lrelu=fused)
        scratch = []
    else:
        kernel = functools.partial(_kernel_multi_k, scale=scale,
                                   fused_lrelu=fused)
        scratch = [pltpu.VMEM((tm, tn), jnp.float32)]

    cost = pl.CostEstimate(
        flops=2 * M * out_dim * in_dim,
        transcendentals=0,
        bytes_accessed=(M * Kp * x_item + Kp * out_dim * w_item
                        + out_dim * 4 + M * out_dim * o_item))

    vmem_limit = int(min(max(needed + (4 << 20), 32 << 20), 48 << 20))

    out = pl.pallas_call(
        kernel,
        out_shape=jax.ShapeDtypeStruct((M, out_dim), out_dtype),
        grid_spec=pltpu.PrefetchScalarGridSpec(
            num_scalar_prefetch=0,
            grid=grid,
            in_specs=[
                pl.BlockSpec((tm, tk), lambda i, j, k: (i, k)),   # x (M,K) tile
                pl.BlockSpec((tk, tn), lambda i, j, k: (k, j)),   # wT (K,N) tile
                pl.BlockSpec((1, tn), lambda i, j, k: (0, j)),    # bias (1,N) tile
            ],
            out_specs=pl.BlockSpec((tm, tn), lambda i, j, k: (i, j)),
            scratch_shapes=scratch,
        ),
        compiler_params=pltpu.CompilerParams(
            dimension_semantics=("parallel", "parallel", "arbitrary"),
            vmem_limit_bytes=vmem_limit),
        cost_estimate=cost,
    )(x2, wT, bias_eff)

    return out.reshape(*lead, out_dim)


def _reference(x, weight, bias, *, lr_mul, bias_init, activation):
    scale = 1.0 / math.sqrt(x.shape[-1]) * lr_mul
    bias_eff = bias.astype(jnp.float32) * lr_mul + bias_init
    y = jnp.einsum('...k,nk->...n',
                   x.astype(jnp.float32),
                   (weight.astype(jnp.float32) * scale),
                   precision=lax.Precision.HIGHEST) + bias_eff
    if activation == 'fused_lrelu':
        y = jnp.where(y >= 0.0, y, 0.2 * y) * math.sqrt(2.0)
    return y


if __name__ == "__main__":
    key = jax.random.PRNGKey(0)
    k_x, k_w, k_b, k_x2, k_w2, k_b2 = jax.random.split(key, 6)

    lr_mul = 0.5
    bias_init = 0.1
    ok = True

    # --- Test 1: small mapping-net style layer (single-K fast path) ---------
    in_dim, out_dim = 32, 32
    weight = jax.random.normal(k_w, (out_dim, in_dim), dtype=jnp.float32) / lr_mul
    bias = 0.05 * jax.random.normal(k_b, (out_dim,), dtype=jnp.float32)
    x = jax.random.normal(k_x, (2, 8, in_dim), dtype=jnp.float32)

    for activation in (None, 'fused_lrelu'):
        out = jax.block_until_ready(
            equal_linear(x, weight, bias, lr_mul=lr_mul, bias_init=bias_init,
                         activation=activation))
        ref = _reference(x, weight, bias, lr_mul=lr_mul, bias_init=bias_init,
                         activation=activation)
        ok = ok and bool(jnp.allclose(out, ref, atol=1e-4, rtol=1e-4))

    # --- Test 2: multi-K accumulator path + K-tail padding + N tiling -------
    in_dim2, out_dim2 = 320, 160
    weight2 = jax.random.normal(k_w2, (out_dim2, in_dim2), dtype=jnp.float32) / lr_mul
    bias2 = 0.05 * jax.random.normal(k_b2, (out_dim2,), dtype=jnp.float32)
    x_b = jax.random.normal(k_x2, (2, 8, in_dim2), dtype=jnp.float32)

    out2 = jax.block_until_ready(
        equal_linear(x_b, weight2, bias2, lr_mul=lr_mul, bias_init=bias_init,
                     activation='fused_lrelu', block_n=128, block_k=128))
    ref2 = _reference(x_b, weight2, bias2, lr_mul=lr_mul, bias_init=bias_init,
                      activation='fused_lrelu')
    ok = ok and bool(jnp.allclose(out2, ref2, atol=1e-3, rtol=1e-3))

    # --- Test 3: bf16 operand path (weight-bandwidth-bound regime) ----------
    out3 = jax.block_until_ready(
        equal_linear(x, weight, bias, lr_mul=lr_mul, bias_init=bias_init,
                     activation='fused_lrelu', operand_dtype=jnp.bfloat16))
    ref3 = _reference(x, weight, bias, lr_mul=lr_mul, bias_init=bias_init,
                      activation='fused_lrelu')
    ok = ok and bool(jnp.allclose(out3, ref3, atol=5e-2, rtol=5e-2))

    if ok:
        print("KERNEL_OK")
    else:
        raise SystemExit("mismatch vs reference")
</pallas_src>

<mosaic_0001>
module attributes {stable_mosaic.version = 11 : i64} {
  func.func @_kernel_single_k(%arg0: i32, %arg1: i32, %arg2: i32, %arg3: memref<16x32xf32, #tpu.memory_space<vmem>>, %arg4: memref<32x32xf32, #tpu.memory_space<vmem>>, %arg5: memref<1x32xf32, #tpu.memory_space<vmem>>, %arg6: memref<16x32xf32, #tpu.memory_space<vmem>>) attributes {dimension_semantics = [#tpu.dimension_semantics<parallel>, #tpu.dimension_semantics<parallel>, #tpu.dimension_semantics<arbitrary>], iteration_bounds = array<i64: 1, 1, 1>, scalar_prefetch = 0 : i64, scratch_operands = 0 : i64, tpu.core_type = #tpu.core_type<tc>, window_params = [{transform_indices = @transform_0, window_bounds = array<i64: 16, 32>}, {transform_indices = @transform_1, window_bounds = array<i64: 32, 32>}, {transform_indices = @transform_2, window_bounds = array<i64: 1, 32>}, {transform_indices = @transform_3, window_bounds = array<i64: 16, 32>}]} {
    %c0 = arith.constant 0 : index
    %c0_0 = arith.constant 0 : index
    %0 = vector.load %arg3[%c0, %c0_0] : memref<16x32xf32, #tpu.memory_space<vmem>>, vector<16x32xf32>
    %c0_1 = arith.constant 0 : index
    %c0_2 = arith.constant 0 : index
    %1 = vector.load %arg4[%c0_1, %c0_2] : memref<32x32xf32, #tpu.memory_space<vmem>>, vector<32x32xf32>
    %cst = arith.constant dense<0.000000e+00> : vector<16x32xf32>
    %2 = tpu.matmul %0, %1, %cst {dimension_numbers = #tpu.dot_dimension_numbers<[1], [0], [0], [1], [0, 0, 1, 1], [], []>} : vector<16x32xf32>, vector<32x32xf32>, vector<16x32xf32> -> vector<16x32xf32>
    %cst_3 = arith.constant 0.0883883461 : f32
    %3 = vector.broadcast %cst_3 : f32 to vector<16x32xf32>
    %4 = arith.mulf %2, %3 : vector<16x32xf32>
    %c0_4 = arith.constant 0 : index
    %c0_5 = arith.constant 0 : index
    %5 = vector.load %arg5[%c0_4, %c0_5] : memref<1x32xf32, #tpu.memory_space<vmem>>, vector<1x32xf32>
    %6 = vector.broadcast %5 : vector<1x32xf32> to vector<16x32xf32>
    %7 = arith.addf %4, %6 : vector<16x32xf32>
    %c0_6 = arith.constant 0 : index
    %c0_7 = arith.constant 0 : index
    %8 = vector.load %arg6[%c0_6, %c0_7] : memref<16x32xf32, #tpu.memory_space<vmem>>, vector<16x32xf32>
    tpu.vector_store %arg6[%c0_6, %c0_7], %7 {strides = array<i32>} : memref<16x32xf32, #tpu.memory_space<vmem>>, vector<16x32xf32>,
    return
  }
  func.func @transform_0(%arg0: i32, %arg1: i32, %arg2: i32) -> (i32, i32) {
    %c0_i32 = arith.constant 0 : i32
    return %arg0, %arg2 : i32, i32
  }
  func.func @transform_1(%arg0: i32, %arg1: i32, %arg2: i32) -> (i32, i32) {
    %c0_i32 = arith.constant 0 : i32
    return %arg2, %arg1 : i32, i32
  }
  func.func @transform_2(%arg0: i32, %arg1: i32, %arg2: i32) -> (i32, i32) {
    %c0_i32 = arith.constant 0 : i32
    %c0_i32_0 = arith.constant 0 : i32
    return %c0_i32, %arg1 : i32, i32
  }
  func.func @transform_3(%arg0: i32, %arg1: i32, %arg2: i32) -> (i32, i32) {
    %c0_i32 = arith.constant 0 : i32
    return %arg0, %arg1 : i32, i32
  }
}

</mosaic_0001>

<bundles_post_ra>
// kernel: tpu_custom_call.1
= control target key start
LH: loop header
LB: loop body
LE: loop exit
PB: predicated region body
PF: predicated region fallthrough
CT: control target
= control target key end

     0   :  { %8 = vsyncpa [#allocation3], 0  ;;  %s303_s0 = inlined_call_operand.hbm [shape: f32[16,32], index: 0, kind: input, shape index: {}]   ;;  %s304_s1 = inlined_call_operand.hbm [shape: f32[32,32], index: 1, kind: input, shape index: {}]   ;;  %s305_s2 = inlined_call_operand.vmem [shape: f32[1,32], index: 2, kind: input, shape index: {}]   ;;  %s306_s3 = inlined_call_operand.hbm [shape: f32[16,32], index: 3, kind: output, shape index: {}]  }
   0x1   :  { %9 = vsyncpa [#allocation6], 0 }
   0x2   :  { %10 = vsyncpa [#allocation4], 0  ;;  %s253_s12 = smov [#allocation2]  }
   0x3   :  { %s16_s13 = sshll.u32 %s253_s12, 4  ;;  %s17_s13 = int_to_ptr.vmem [resolvable:$true] %s16_s13 }
   0x4   :  { %s195_s14 = scalar_lea.vmem %s17_s13, 256  ;;  %p200_p1 = scmp.lt.s32.totalorder %s17_s13, %s17_s13 }
   0x5   :  { %p196_p0 = scmp.ne.s32.totalorder %s17_s13, %s195_s14  ;;  %p201_p2 = scmp.lt.s32.totalorder %s195_s14, %s195_s14 }
   0x7   :  { %p202_p3 = por %p201_p2, %p200_p1 }
   0x9   :  { %p203_p4 = pnand %p202_p3, %p196_p0 }
   0xb   :  { %206 = shalt.err (!%p203_p4)
}
   0xc   :  { %s254_s15 = smov 128   ;;  %s255_s16 = smov 8  }
   0xd   :  { %22 = dma.hbm_to_vmem [thread:$0]  %s303_s0, 256, %s17_s13, [#allocation3], %s254_s15, %s254_s15, %s255_s16  }
   0xe   :  { %s256_s19 = smov [#allocation5]  }
   0xf   :  { %s28_s20 = sshll.u32 %s256_s19, 4  ;;  %s29_s20 = int_to_ptr.vmem [resolvable:$true] %s28_s20 }
  0x10   :  { %s215_s21 = scalar_lea.vmem %s29_s20, 512  ;;  %p220_p6 = scmp.lt.s32.totalorder %s29_s20, %s29_s20 }
  0x11   :  { %p216_p5 = scmp.ne.s32.totalorder %s29_s20, %s215_s21  ;;  %p221_p7 = scmp.lt.s32.totalorder %s215_s21, %s215_s21 }
  0x13   :  { %p222_p8 = por %p221_p7, %p220_p6 }
  0x15   :  { %p223_p9 = pnand %p222_p8, %p216_p5 }
  0x17   :  { %226 = shalt.err (!%p223_p9)
}
  0x18   :  { %34 = dma.hbm_to_vmem [thread:$0]  %s304_s1, 512, %s29_s20, [#allocation6], %s254_s15, %s254_s15, %s255_s16  }
  0x19   :  { %247 = dma.done.wait [#allocation3], 256  }
  0x1a   :  { %248 = vsyncadd [#allocation3], 4294967040 }
  0x1b   :  { %249 = dma.done.wait [#allocation6], 512  }
  0x1c   :  { %250 = vsyncadd [#allocation6], 4294966784  ;;  %vm49_vm0 = vcmask 261120   ;;  %v48_v0 = vld [vmem:[#allocation5 + $0x18] sm:$0xff]  ;;  %v47_v1 = vld [vmem:[#allocation5 + $0x10] sm:$0xff]  ;;  %s257_s24 = smov [#allocation7]  }
  0x1d   :  { %171 = vmatprep.subr.mxu0 %v48_v0  ;;  %v43_v2 = vld [vmem:[#allocation2] sm:$0xff]  ;;  %v46_v3 = vld [vmem:[#allocation5 + $0x8] sm:$0xff]  ;;  %v45_v4 = vld [vmem:[#allocation5] sm:$0xff]  ;;  %s149_s25 = sshll.u32 %s257_s24, 4  ;;  %s150_s25 = int_to_ptr.vmem [resolvable:$true] %s149_s25 }
  0x1e   :  { %172 = vmatpush3.msra.mxu0 %v48_v0  ;;  %179 = vmatprep.mubr.msk.f32.mxu0 %vm49_vm0, %v43_v2  ;;  %v44_v5 = vld [vmem:[#allocation2 + $0x8] sm:$0xff]  ;;  %v164_v7 = vld [vmem:[%s305_s2] ss:$0 sm:$0xff]  ;;  %s227_s26 = scalar_lea.vmem %s150_s25, 256  ;;  %p232_p11 = scmp.lt.s32.totalorder %s150_s25, %s150_s25 }
  0x1f   :  { %173 = vmatprep.subr.mxu0 %v47_v1  ;;  %p228_p10 = scmp.ne.s32.totalorder %s150_s25, %s227_s26  ;;  %p233_p12 = scmp.lt.s32.totalorder %s227_s26, %s227_s26 }
  0x20   :  { %174 = vmatpush3.msra.mxu0 %v47_v1 }
  0x21   :  { %175 = vmatprep.subr.mxu0 %v46_v3  ;;  %p234_p13 = por %p233_p12, %p232_p11 }
  0x22   :  { %176 = vmatpush3.msra.mxu0 %v46_v3 }
  0x23   :  { %177 = vmatprep.subr.mxu0 %v45_v4  ;;  %p235_p0 = pnand %p234_p13, %p228_p10 }
  0x24   :  { %178 = vmatpush3.msra.mxu0 %v45_v4 }
  0x25   :  { %180 = vmatmul.mubr.msk.f32.vlgmr.msra.gmra.mxu0 %vm49_vm0, %v44_v5 }
  0xe5   :  { %v181_v6 = vpop.f32.mrf.mxu0 }
  0xe6   :  { %v132_v8 = vmul.f32 0.088388346, %v181_v6 }
  0xe7   :  { %v122_v9 = vpop.f32.mrf.mxu0 }
  0xe8   :  { %v141_v10 = vadd.f32 %v164_v7, %v132_v8  ;;  %v131_v11 = vmul.f32 0.088388346, %v122_v9 }
  0xea   :  { %143 = vst.msk [vmem:[#allocation7 + $0x8] sm:$0xff] %vm49_vm0, %v141_v10  ;;  %v140_v12 = vadd.f32 %v164_v7, %v131_v11 }
  0xec   :  { %142 = vst.msk [vmem:[#allocation7] sm:$0xff] %vm49_vm0, %v140_v12 }
  0xed   :  { %238 = shalt.err (!%p235_p0)
}
  0xee   :  { %155 = dma.vmem_to_hbm [thread:$0]  %s150_s25, 256, %s306_s3, [#allocation4], %s254_s15, %s254_s15, %s255_s16  }
  0xef   :  { %251 = dma.done.wait [#allocation4], 256  }
  0xf0   :  { %252 = vsyncadd [#allocation4], 4294967040 }
  0xf1   :  { %159 = vsyncpa [#allocation3], 1 }
  0xf2   :  { %160 = vsyncpa [#allocation6], 1 }
  0xf3   :  { %161 = vsyncpa [#allocation4], 1 }

</bundles_post_ra>
